<compile_context>
chip_gen: v7x
topology: tpu7x:2x2x1
jax: 0.10.0
libtpu: 0.0.40
codegen_flags: <defaults>
</compile_context>

<pallas_src>
import functools

import jax
import jax.numpy as jnp
from jax.experimental import pallas as pl
from jax.experimental.pallas import tpu as pltpu


# ---------------------------------------------------------------------------
# Tile selection helpers
# ---------------------------------------------------------------------------

def _largest_divisor(n, limit, multiple_of=1):
    """Largest d with d | n, d <= limit, d % multiple_of == 0; else None."""
    best = None
    d = 1
    while d * d <= n:
        if n % d == 0:
            for cand in (d, n // d):
                if cand <= limit and cand % multiple_of == 0:
                    if best is None or cand > best:
                        best = cand
        d += 1
    return best


def _vmem_budget():
    """(target_tile_bytes, vmem_limit_bytes), generation aware."""
    try:
        vmem_cap = int(pltpu.get_tpu_info().vmem_capacity_bytes)
    except Exception:
        vmem_cap = 64 * 2**20  # be conservative (v7x-sized) if query fails
    if vmem_cap <= 64 * 2**20:
        # v7x: 64 MiB physical VMEM per core -> keep double-buffered in+out
        # footprint (~4x tile) well under the scoped limit.
        return 4 * 2**20, 48 * 2**20
    # v5e / v6e: 128 MiB physical; raise scoped limit (v5e default is 16 MiB).
    return 8 * 2**20, 96 * 2**20


def _pick_tiles(N, C, HW, dtype, target_bytes):
    """Pick (block_n, block_c, block_hw, num_n, num_c, num_hw, mask_tail)."""
    itemsize = jnp.dtype(dtype).itemsize
    # Sublane alignment is dtype-aware: packed dtypes need taller tiles.
    sub_align = {4: 8, 2: 16, 1: 32}.get(itemsize, 8)
    lane_target = 8192

    # ---- lane (HW) tile ----
    mask_tail = False
    if HW % 128 == 0:
        block_hw = _largest_divisor(HW, lane_target, 128) or HW
        num_hw = HW // block_hw
    elif HW <= lane_target:
        block_hw = HW                       # full dim (always legal)
        num_hw = 1
    else:
        block_hw = lane_target              # 128-aligned; tail masked in pass 1
        num_hw = -(-HW // block_hw)
        mask_tail = (HW % block_hw) != 0

    # ---- channel tile ----
    if C % sub_align == 0:
        limit = max(sub_align, target_bytes // max(1, block_hw * itemsize))
        block_c = _largest_divisor(C, limit, sub_align) or C
    else:
        block_c = C                         # full dim (typically small C)
    num_c = C // block_c

    # ---- batch tile: grow until the tile reaches the target volume, but keep
    # at least 2 parallel grid points (megacore / v7x) when the problem allows.
    tile_row_bytes = block_c * block_hw * itemsize
    block_n = 1
    for bn in range(1, N + 1):
        if N % bn:
            continue
        if bn * tile_row_bytes > target_bytes:
            break
        if (N // bn) * num_c < 2 <= N * num_c:
            break
        block_n = bn
    num_n = N // block_n

    return block_n, block_c, block_hw, num_n, num_c, num_hw, mask_tail


# ---------------------------------------------------------------------------
# Kernels
# ---------------------------------------------------------------------------

def _partial_sum_kernel(x_ref, psum_ref, *, hw_total, block_hw, mask_tail):
    # x_ref:    (block_n, block_c, block_hw) input tile
    # psum_ref: (1, block_c, 1) f32 partial sum for this N-split (accumulated
    #           directly in the VMEM-resident output block across hw tiles).
    l = pl.program_id(2)

    @pl.when(l == 0)
    def _():
        psum_ref[...] = jnp.zeros_like(psum_ref)

    xt = x_ref[...].astype(jnp.float32)
    if mask_tail:
        lane = jax.lax.broadcasted_iota(jnp.int32, xt.shape, 2)
        valid = (l * block_hw + lane) < hw_total
        xt = jnp.where(valid, xt, 0.0)
    s = jnp.sum(xt, axis=2, keepdims=True)          # (block_n, block_c, 1)
    psum_ref[...] += jnp.sum(s, axis=0, keepdims=True)


def _apply_kernel(off_ref, x_ref, out_ref):
    # off_ref: (block_c, 1) f32  = bias - mean  (per-channel offset)
    # x_ref / out_ref: (block_n, block_c, block_hw)
    out_ref[...] = (
        x_ref[...].astype(jnp.float32) + off_ref[...]).astype(out_ref.dtype)


# ---------------------------------------------------------------------------
# Forward wrapper
# ---------------------------------------------------------------------------

def mean_bn_old_forward(x_nchw, bias, running_mean, momentum=0.1, training=True):
    """Forward pass of MeanBNOld.

    x_nchw:       (N, C, H, W)
    bias:         (C,) or None
    running_mean: (C,)
    Returns (out_nchw, new_running_mean).
    """
    N, C, H, W = x_nchw.shape
    HW = H * W
    dtype = x_nchw.dtype
    itemsize = jnp.dtype(dtype).itemsize
    x3 = x_nchw.reshape(N, C, HW)           # free view on NCHW layout (no copy)

    target_bytes, vmem_limit = _vmem_budget()
    (block_n, block_c, block_hw,
     num_n, num_c, num_hw, mask_tail) = _pick_tiles(N, C, HW, dtype, target_bytes)

    if training:
        psums = pl.pallas_call(
            functools.partial(_partial_sum_kernel, hw_total=HW,
                              block_hw=block_hw, mask_tail=mask_tail),
            out_shape=jax.ShapeDtypeStruct((num_n, C, 1), jnp.float32),
            grid=(num_n, num_c, num_hw),
            in_specs=[
                pl.BlockSpec((block_n, block_c, block_hw),
                             lambda n, c, l: (n, c, l)),
            ],
            out_specs=pl.BlockSpec((1, block_c, 1), lambda n, c, l: (n, c, 0)),
            compiler_params=pltpu.CompilerParams(
                dimension_semantics=("parallel", "parallel", "arbitrary"),
                vmem_limit_bytes=vmem_limit),
            cost_estimate=pl.CostEstimate(
                flops=N * C * HW,
                transcendentals=0,
                bytes_accessed=N * C * HW * itemsize + num_n * C * 4),
        )(x3)
        # Tiny cross-split reduce + normalize in XLA (num_n * C values).
        mean = psums.sum(axis=0).reshape(C) * (1.0 / float(N * HW))
        # Module's own convention: running = running*momentum + mean*(1-momentum)
        new_running_mean = running_mean * momentum + mean * (1.0 - momentum)
    else:
        mean = running_mean.astype(jnp.float32)
        new_running_mean = running_mean

    if bias is None:
        off_c1 = (-mean).reshape(C, 1)
    else:
        off_c1 = (bias.astype(jnp.float32) - mean).reshape(C, 1)

    out3 = pl.pallas_call(
        _apply_kernel,
        out_shape=jax.ShapeDtypeStruct((N, C, HW), dtype),
        grid=(num_n, num_c, num_hw),
        in_specs=[
            pl.BlockSpec((block_c, 1), lambda n, c, l: (c, 0)),
            pl.BlockSpec((block_n, block_c, block_hw),
                         lambda n, c, l: (n, c, l)),
        ],
        out_specs=pl.BlockSpec((block_n, block_c, block_hw),
                               lambda n, c, l: (n, c, l)),
        compiler_params=pltpu.CompilerParams(
            dimension_semantics=("parallel", "parallel", "parallel"),
            vmem_limit_bytes=vmem_limit),
        cost_estimate=pl.CostEstimate(
            flops=N * C * HW,
            transcendentals=0,
            bytes_accessed=2 * N * C * HW * itemsize + C * 4),
    )(off_c1, x3)

    return out3.reshape(N, C, H, W), new_running_mean


# ---------------------------------------------------------------------------
# Demo / self-test
# ---------------------------------------------------------------------------

if __name__ == "__main__":
    key = jax.random.PRNGKey(0)
    kx, kb, kr = jax.random.split(key, 3)

    N, C, H, W = 2, 4, 16, 16
    x = jax.random.normal(kx, (N, C, H, W), dtype=jnp.float32)
    bias = jax.random.normal(kb, (C,), dtype=jnp.float32)
    running_mean = jax.random.normal(kr, (C,), dtype=jnp.float32) * 0.1

    # --- training mode ---
    out, new_rm = mean_bn_old_forward(x, bias, running_mean,
                                      momentum=0.1, training=True)
    out = jax.block_until_ready(out)
    new_rm = jax.block_until_ready(new_rm)

    mean_ref = x.reshape(N, C, -1).mean(-1).mean(0)
    out_ref = x - mean_ref.reshape(1, C, 1, 1) + bias.reshape(1, C, 1, 1)
    rm_ref = running_mean * 0.1 + mean_ref * 0.9
    assert jnp.allclose(out, out_ref, atol=1e-5), "training output mismatch"
    assert jnp.allclose(new_rm, rm_ref, atol=1e-5), "running_mean mismatch"

    # --- eval mode ---
    out_e, rm_e = mean_bn_old_forward(x, bias, running_mean,
                                      momentum=0.1, training=False)
    out_e = jax.block_until_ready(out_e)
    out_e_ref = x - running_mean.reshape(1, C, 1, 1) + bias.reshape(1, C, 1, 1)
    assert jnp.allclose(out_e, out_e_ref, atol=1e-5), "eval output mismatch"
    assert jnp.allclose(rm_e, running_mean), "eval must not update running_mean"

    print("KERNEL_OK")
</pallas_src>

<mosaic_0001>
module attributes {stable_mosaic.version = 11 : i64} {
  func.func @_partial_sum_kernel(%arg0: i32, %arg1: i32, %arg2: i32, %arg3: memref<1x4x256xf32, #tpu.memory_space<vmem>>, %arg4: memref<1x4x1xf32, #tpu.memory_space<vmem>>) attributes {dimension_semantics = [#tpu.dimension_semantics<parallel>, #tpu.dimension_semantics<parallel>, #tpu.dimension_semantics<arbitrary>], iteration_bounds = array<i64: 2, 1, 1>, scalar_prefetch = 0 : i64, scratch_operands = 0 : i64, tpu.core_type = #tpu.core_type<tc>, window_params = [{transform_indices = @transform_0, window_bounds = array<i64: 1, 4, 256>}, {transform_indices = @transform_1, window_bounds = array<i64: 1, 4, 1>}]} {
    %c0_i32 = arith.constant 0 : i32
    %0 = arith.cmpi eq, %arg2, %c0_i32 : i32
    %1 = arith.extui %0 : i1 to i32
    %c0_i32_0 = arith.constant 0 : i32
    %2 = arith.cmpi ne, %1, %c0_i32_0 : i32
    scf.if %2 {
      %cst_10 = arith.constant 0.000000e+00 : f32
      %11 = vector.broadcast %cst_10 : f32 to vector<1x4x1xf32>
      %c0_11 = arith.constant 0 : index
      %c0_12 = arith.constant 0 : index
      %c0_13 = arith.constant 0 : index
      %12 = vector.load %arg4[%c0_11, %c0_12, %c0_13] : memref<1x4x1xf32, #tpu.memory_space<vmem>>, vector<1x4x1xf32>
      tpu.vector_store %arg4[%c0_11, %c0_12, %c0_13], %11 {strides = array<i32>} : memref<1x4x1xf32, #tpu.memory_space<vmem>>, vector<1x4x1xf32>,
    } else {
    }
    %c0 = arith.constant 0 : index
    %c0_1 = arith.constant 0 : index
    %c0_2 = arith.constant 0 : index
    %3 = vector.load %arg3[%c0, %c0_1, %c0_2] : memref<1x4x256xf32, #tpu.memory_space<vmem>>, vector<1x4x256xf32>
    %cst = arith.constant dense<0.000000e+00> : vector<1x4xf32>
    %4 = vector.multi_reduction <add>, %3, %cst [2] : vector<1x4x256xf32> to vector<1x4xf32>
    %5 = vector.shape_cast %4 : vector<1x4xf32> to vector<1x4x1xf32>
    %c0_3 = arith.constant 0 : index
    %c0_4 = arith.constant 0 : index
    %c0_5 = arith.constant 0 : index
    %6 = vector.load %arg4[%c0_3, %c0_4, %c0_5] : memref<1x4x1xf32, #tpu.memory_space<vmem>>, vector<1x4x1xf32>
    %cst_6 = arith.constant dense<0.000000e+00> : vector<4x1xf32>
    %7 = vector.multi_reduction <add>, %5, %cst_6 [0] : vector<1x4x1xf32> to vector<4x1xf32>
    %8 = vector.shape_cast %7 : vector<4x1xf32> to vector<1x4x1xf32>
    %9 = arith.addf %6, %8 : vector<1x4x1xf32>
    %c0_7 = arith.constant 0 : index
    %c0_8 = arith.constant 0 : index
    %c0_9 = arith.constant 0 : index
    %10 = vector.load %arg4[%c0_7, %c0_8, %c0_9] : memref<1x4x1xf32, #tpu.memory_space<vmem>>, vector<1x4x1xf32>
    tpu.vector_store %arg4[%c0_7, %c0_8, %c0_9], %9 {strides = array<i32>} : memref<1x4x1xf32, #tpu.memory_space<vmem>>, vector<1x4x1xf32>,
    return
  }
  func.func @transform_0(%arg0: i32, %arg1: i32, %arg2: i32) -> (i32, i32, i32) {
    %c0_i32 = arith.constant 0 : i32
    return %arg0, %arg1, %arg2 : i32, i32, i32
  }
  func.func @transform_1(%arg0: i32, %arg1: i32, %arg2: i32) -> (i32, i32, i32) {
    %c0_i32 = arith.constant 0 : i32
    %c0_i32_0 = arith.constant 0 : i32
    return %arg0, %arg1, %c0_i32 : i32, i32, i32
  }
}

</mosaic_0001>

<bundles_post_ra>
// kernel: tpu_custom_call.1
= control target key start
LH: loop header
LB: loop body
LE: loop exit
PB: predicated region body
PF: predicated region fallthrough
CT: control target
= control target key end

     0   :  { %6 = vsyncpa [#allocation3], 0  ;;  %s570_s0 = inlined_call_operand.hbm [shape: f32[2,4,256], index: 0, kind: input, shape index: {}]   ;;  %s571_s1 = inlined_call_operand.vmem [shape: f32[2,4,1], index: 1, kind: output, shape index: {}]  }
   0x1   :  { %8 = vsyncpa [#allocation3 + $0x1], 0  ;;  %s445_s6 = smov 0   ;;  %s447_s7 = smov 0  }
   0x2   :  { %s449_s8 = smov 0   ;;  %s451_s9 = smov 0  }
   0x3   :  { %s453_s10 = smov 0   ;;  %s455_s11 = smov 0  }
   0x4 LB: > { %s281_s12 = sadd.s32 4294967295, %s431_s11   ;;  %s33_s13 = sadd.s32 1, %s427_s10  ;;  %s431_s11 = sphi %s455_s11, %s14_s11   ;;  %s427_s10 = sphi %s453_s10, %s581_s10   ;;  %s423_s9 = sphi %s451_s9, %s580_s9   ;;  %s419_s8 = sphi %s449_s8, %s579_s8   ;;  %s415_s7 = sphi %s447_s7, %s578_s7   ;;  %s411_s6 = sphi %s445_s6, %s577_s6  }
   0x5   : > { %p35_p0 = scmp.ge.s32.totalorder %s33_s13, 2  ;;  %s44_s14 = sadd.s32 1, %s419_s8 }
   0x6   : > { %p51_p1 = scmp.ne.s32.totalorder %s419_s8, %s415_s7  ;;  %p52_p2 = scmp.eq.s32.totalorder %s431_s11, 0 }
   0x7   : > { %s583_s13 = smov (%p35_p0, %s33_s13), 0  ;;  %p57_p4 = scmp.ne.s32.totalorder %s415_s7, %s411_s6 }
   0x8   : > { %p481_p3 = por %p52_p2, %p51_p1  ;;  %s37_s16 = ssub.s32 %s427_s10, %s583_s13 }
   0x9   : > { %p58_p5 = scmp.eq.s32.totalorder %s281_s12, 0  ;;  %p42_p6 = scmp.eq.s32.totalorder %s37_s16, 0 }
   0xa   : > { %p300_p8 = scmp.lt.s32.totalorder %s431_s11, 2  ;;  %s109_s19 = sand.u32 1, %s419_s8  }
   0xb   : > { %p488_p7 = por %p58_p5, %p57_p4  ;;  %s293_s20 = sshll.u32 %s427_s10, 7 }
   0xc   : > { %s494_s18 = scalar_select %p42_p6, %s419_s8, %s44_s14  }
   0xd   : > { %s285_s21 = sshll.u32 %s109_s19, 3  ;;  %s501_s24 = scalar_lea.hbm %s570_s0, %s293_s20 }
   0xe   : > { %s113_s25 = scalar_lea.vmem [#allocation2], %s285_s21  ;;  %p505_p9 = pnand %p300_p8, %p481_p3 }
   0xf   : > { %s125_s26 = sshll.u32 %s113_s25, 4  ;;  %s110_s28 = scalar_lea.sflag [#allocation3], %s109_s19  ;;  %s509_s26 = int_to_ptr.vmem [resolvable:$true] %s125_s26 }
  0x10   : > { %s351_s29 = scalar_lea.hbm %s501_s24, 128  ;;  %p353_p13 = pneg %p505_p9 }
  0x11   : > { %p352_p12 = scmp.ne.s32.totalorder %s501_s24, %s351_s29  ;;  %s356_s3 = scalar_lea.hbm %s570_s0, 256 }
  0x12   : > { %p357_p2 = scmp.lt.u32.totalorder %s501_s24, %s570_s0  ;;  %p358_p3 = scmp.lt.u32.totalorder %s356_s3, %s351_s29 }
  0x13   : > { %p354_p0 = pnand %p353_p13, %p352_p12  ;;  %p360_p5 = scmp.lt.u32.totalorder %s351_s29, %s501_s24 }
  0x14   : > { %p359_p4 = por %p358_p3, %p357_p2 }
  0x15   : > { %p355_p1 = pneg %p354_p0 }
  0x16   : > { %p361_p6 = por %p360_p5, %p359_p4 }
  0x18   : > { %p362_p8 = pnand %p361_p6, %p355_p1 }
  0x1a   : > { %365 = shalt.err (!%p362_p8)
}
  0x1b   : > { %s366_s6 = scalar_lea.vmem %s509_s26, 128  ;;  %s433_s12 = smov [#allocation2]  }
  0x1c   : > { %p367_p12 = scmp.ne.s32.totalorder %s509_s26, %s366_s6  ;;  %s371_s14 = sshll.u32 %s433_s12, 4  ;;  %s372_s14 = int_to_ptr.vmem [resolvable:$false] %s371_s14 }
  0x1d   : > { %s373_s15 = scalar_lea.vmem %s372_s14, 256  ;;  %p374_p11 = scmp.lt.s32.totalorder %s509_s26, %s372_s14 }
  0x1e   : > { %p369_p0 = pnand %p367_p12, %p353_p13  ;;  %p375_p2 = scmp.lt.s32.totalorder %s373_s15, %s366_s6 }
  0x20   : > { %p370_p10 = pneg %p369_p0  ;;  %p376_p3 = por %p375_p2, %p374_p11 }
  0x22   : > { %p377_p4 = pnand %p376_p3, %p370_p10 }
  0x24   : > { %380 = shalt.err (!%p377_p4)
}
  0x25   : > { %299 = dma.hbm_to_vmem [thread:$0]  (!%p505_p9), %s501_s24, 128, %s509_s26, %s110_s28  }
  0x26   : > { %p575_p1 = scmp.lt.s32.totalorder %s431_s11, 3  ;;  %p576_p5 = scmp.ge.s32.totalorder %s431_s11, 1 }
  0x28   : > { %p131_p13 = pnand %p576_p5, %p575_p1 }
  0x29   : > { %s136_s16 = sand.u32 (!%p131_p13), 1, %s415_s7  }
  0x2a   : > { %134 = sbr.rel (%p131_p13) target bundleno = 201 (0xc9), region = 24  ;;  %s289_s19 = sshll.u32 (!%p131_p13), %s136_s16, 3 }
  0x2b   : > { %s137_s20 = scalar_lea.sflag (!%p131_p13), [#allocation3], %s136_s16  ;;  %s140_s21 = scalar_lea.vmem (!%p131_p13), [#allocation2], %s289_s19 }
  0x31   : > { %406 = dma.done.wait (%p488_p7), %s137_s20, 128  }
  0x32   : > { %408 = vsyncadd (%p488_p7), %s137_s20, 4294967168  ;;  %p162_p10 = scmp.lt.s32.totalorder %s423_s9, 1  ;;  %vm173_vm0 = vcmask 3072   ;;  %vm179_vm1 = vcmask 1043456   ;;  %v434_v0 = vmov 0.0   ;;  %v175_v1 = vld [vmem:[%s140_s21] sm:$0xff] }
  0x33   : > { %v177_v2 = vcombine.high %v175_v1, %v175_v1  ;;  %v180_v3 = vsel %vm179_vm1, %v175_v1, 0.0 }
  0x34   : > { %s585_s9 = smov (!%p162_p10, %s423_s9), 1 }
  0x35   : > { %s290_s22 = sshll.u32 %s585_s9, 2  ;;  %v181_v4 = vsel %vm179_vm1, %v177_v2, 0.0 }
  0x36   : > { %s168_s25 = scalar_lea.vmem %s571_s1, %s290_s22  ;;  %v182_v5 = vadd.f32 %v181_v4, %v180_v3 }
  0x37   : > { %174 = vst.msk [vmem:[%s168_s25] sm:$0xf] %vm173_vm0, %v434_v0 }
  0x38   : > { %183 = vadd.xlane.f32.xlu0 %v182_v5 }
  0x3e   : > { %v185_v6 = vld [vmem:[%s168_s25] sm:$0xf] }
  0xc5   : > { %v184_v7 = vpop.xlane.xlu0 %183 }
  0xc6   : > { %v187_v8 = vadd.f32 %v185_v6, %v184_v7 }
  0xc8   : > { %189 = vst.msk [vmem:[%s168_s25] sm:$0xf] %vm173_vm0, %v187_v8 }
  0xc9 PF: > { %s14_s11 = sadd.s32 1, %s431_s11   ;;  %s577_s6 = smov %s415_s7 }
  0xca   : > { %p11_p7 = scmp.ge.s32.totalorder %s14_s11, 4   ;;  %s578_s7 = smov %s419_s8 }
  0xcb   : > { %s579_s8 = smov %s494_s18  ;;  %s580_s9 = smov %s427_s10 }
  0xcc   : > { %s581_s10 = smov %s583_s13  ;;  %13 = sbr.rel (!%p11_p7) target bundleno = 4 (0x4), region = 68 }
  0xd3   :  { %215 = vsyncpa [#allocation3], 1 }
  0xd4   :  { %217 = vsyncpa [#allocation3 + $0x1], 1 }

</bundles_post_ra>
